<compile_context>
chip_gen: v5e
topology: v5e:2x2
jax: 0.10.0
libtpu: 0.0.40
codegen_flags: <defaults>
</compile_context>

<pallas_src>
import jax
import jax.numpy as jnp
from jax.experimental import pallas as pl
from jax.experimental.pallas import tpu as pltpu

IN_DIM = 28 * 28   # 784
H_DIM = 100
CODE_DIM = 30

# Lane-padded internal dims (multiples of 128) -> dense MXU tiles & dense stores.
H_PAD = 128
CODE_PAD = 128


def autoencoder_kernel(x_ref,
                       w1_ref, b1_ref,
                       w2_ref, b2_ref,
                       w3_ref, b3_ref,
                       w4_ref, b4_ref,
                       out_ref, enc_ref):
    """One batch tile of the full encoder+decoder MLP (MXU matmuls, VPU/EUP rest)."""
    cdt = w1_ref.dtype                       # compute dtype (f32 or bf16)
    x = x_ref[...].astype(cdt)               # (TB, 784)

    # ---- encoder ----
    h1 = jnp.dot(x, w1_ref[...], preferred_element_type=jnp.float32) + b1_ref[...]
    h1 = jnp.maximum(h1, 0.0)                                         # (TB, 128)

    enc = jnp.dot(h1.astype(cdt), w2_ref[...],
                  preferred_element_type=jnp.float32) + b2_ref[...]
    enc = jnp.maximum(enc, 0.0)                                       # (TB, 128); cols 30.. are 0

    # ---- decoder ----
    h3 = jnp.dot(enc.astype(cdt), w3_ref[...],
                 preferred_element_type=jnp.float32) + b3_ref[...]
    h3 = jnp.maximum(h3, 0.0)                                         # (TB, 128)

    logits = jnp.dot(h3.astype(cdt), w4_ref[...],
                     preferred_element_type=jnp.float32) + b4_ref[...]
    out_ref[...] = jax.nn.sigmoid(logits).astype(out_ref.dtype)       # (TB, 784)
    enc_ref[...] = enc.astype(enc_ref.dtype)                          # (TB, 128) dense store


def _pad2d(a, rows, cols):
    r, c = a.shape
    return jnp.pad(a, ((0, rows - r), (0, cols - c)))


def autoencoder_forward(x_nchw, params, *, batch_tile=256, compute_dtype=jnp.float32):
    """Autoencoder forward.  x_nchw: (B, 1, 28, 28) float32.  Returns (out, encoded)."""
    w1, b1, w2, b2, w3, b3, w4, b4 = params
    B = x_nchw.shape[0]

    # torch: x.view(-1, 28*28)  (row-major flatten of NCHW)
    x2d = x_nchw.reshape(B, IN_DIM).astype(jnp.float32)

    # ---- batch tile selection: sublane-aligned, and >=2 grid steps when possible
    #      (keeps both TensorCores busy on v7x via dimension_semantics="parallel").
    bt = max(8, min(int(batch_tile), B))
    bt = max(8, (bt // 8) * 8)
    if -(-B // bt) < 2 and bt >= 16:
        bt = max(8, ((bt // 2) // 8) * 8)
    n_steps = -(-B // bt)
    B_pad = n_steps * bt
    if B_pad != B:
        x2d = jnp.pad(x2d, ((0, B_pad - B), (0, 0)))

    # ---- lane-pad weights/biases (zero padding keeps the math exact) ----
    w1p = _pad2d(w1, IN_DIM, H_PAD).astype(compute_dtype)
    b1p = _pad2d(b1, 1, H_PAD).astype(jnp.float32)
    w2p = _pad2d(w2, H_PAD, CODE_PAD).astype(compute_dtype)
    b2p = _pad2d(b2, 1, CODE_PAD).astype(jnp.float32)
    w3p = _pad2d(w3, CODE_PAD, H_PAD).astype(compute_dtype)
    b3p = _pad2d(b3, 1, H_PAD).astype(jnp.float32)
    w4p = _pad2d(w4, H_PAD, IN_DIM).astype(compute_dtype)
    b4p = b4.astype(jnp.float32)

    # Weights/biases: constant block index -> fetched once, resident across the grid.
    def const(shape):
        return pl.BlockSpec(shape, lambda i: (0, 0))

    out2d, encp = pl.pallas_call(
        autoencoder_kernel,
        out_shape=(
            jax.ShapeDtypeStruct((B_pad, IN_DIM), jnp.float32),
            jax.ShapeDtypeStruct((B_pad, CODE_PAD), jnp.float32),
        ),
        grid=(n_steps,),
        in_specs=[
            pl.BlockSpec((bt, IN_DIM), lambda i: (i, 0)),    # x
            const((IN_DIM, H_PAD)),   const((1, H_PAD)),     # w1, b1
            const((H_PAD, CODE_PAD)), const((1, CODE_PAD)),  # w2, b2
            const((CODE_PAD, H_PAD)), const((1, H_PAD)),     # w3, b3
            const((H_PAD, IN_DIM)),   const((1, IN_DIM)),    # w4, b4
        ],
        out_specs=(
            pl.BlockSpec((bt, IN_DIM), lambda i: (i, 0)),    # reconstruction
            pl.BlockSpec((bt, CODE_PAD), lambda i: (i, 0)),  # encoded (lane-dense)
        ),
        compiler_params=pltpu.CompilerParams(
            dimension_semantics=("parallel",),
            vmem_limit_bytes=48 * 1024 * 1024,
        ),
    )(x2d, w1p, b1p, w2p, b2p, w3p, b3p, w4p, b4p)

    out = out2d[:B].reshape(B, 1, 28, 28)
    enc = encp[:B, :CODE_DIM]
    return out, enc


def init_params(key):
    """Deterministic synthetic weights (PyTorch Linear shapes, stored as (in, out))."""
    def linear(key, fan_in, fan_out):
        kw, kb = jax.random.split(key)
        bound = 1.0 / jnp.sqrt(fan_in)
        w = jax.random.uniform(kw, (fan_in, fan_out), jnp.float32, -bound, bound)
        b = jax.random.uniform(kb, (1, fan_out), jnp.float32, -bound, bound)
        return w, b

    k1, k2, k3, k4 = jax.random.split(key, 4)
    w1, b1 = linear(k1, IN_DIM, H_DIM)      # encoder Linear(784, 100)
    w2, b2 = linear(k2, H_DIM, CODE_DIM)    # encoder Linear(100, 30)
    w3, b3 = linear(k3, CODE_DIM, H_DIM)    # decoder Linear(30, 100)
    w4, b4 = linear(k4, H_DIM, IN_DIM)      # decoder Linear(100, 784)
    return (w1, b1, w2, b2, w3, b3, w4, b4)


def reference_forward(x_nchw, params):
    """Pure-JAX reference for correctness check."""
    w1, b1, w2, b2, w3, b3, w4, b4 = params
    x = x_nchw.reshape(x_nchw.shape[0], IN_DIM)
    h1 = jax.nn.relu(x @ w1 + b1)
    enc = jax.nn.relu(h1 @ w2 + b2)
    h3 = jax.nn.relu(enc @ w3 + b3)
    out = jax.nn.sigmoid(h3 @ w4 + b4)
    return out.reshape(x_nchw.shape[0], 1, 28, 28), enc


if __name__ == "__main__":
    key = jax.random.PRNGKey(0)
    k_param, k_data = jax.random.split(key)

    B = 16  # small test batch (production would use 256+ with batch_tile>=256)
    params = init_params(k_param)
    x = jax.random.uniform(k_data, (B, 1, 28, 28), jnp.float32)

    ref_out, ref_enc = reference_forward(x, params)

    # f32 path, explicit small tile -> multi-step grid exercises the pipeline.
    out, enc = autoencoder_forward(x, params, batch_tile=8)
    out = jax.block_until_ready(out)
    enc = jax.block_until_ready(enc)
    assert out.shape == (B, 1, 28, 28) and enc.shape == (B, CODE_DIM)
    assert jnp.allclose(out, ref_out, atol=1e-5, rtol=1e-5)
    assert jnp.allclose(enc, ref_enc, atol=1e-5, rtol=1e-5)

    # bf16-weight fast path (f32 accumulation), default large-tile heuristics.
    out_bf, enc_bf = autoencoder_forward(x, params, batch_tile=256,
                                         compute_dtype=jnp.bfloat16)
    out_bf = jax.block_until_ready(out_bf)
    enc_bf = jax.block_until_ready(enc_bf)
    assert jnp.allclose(out_bf, ref_out, atol=5e-2, rtol=5e-2)
    assert jnp.allclose(enc_bf, ref_enc, atol=5e-2, rtol=5e-2)

    print("KERNEL_OK")
</pallas_src>

<mosaic_0001>
module attributes {stable_mosaic.version = 11 : i64} {
  func.func @autoencoder_kernel(%arg0: i32, %arg1: memref<8x784xf32, #tpu.memory_space<vmem>>, %arg2: memref<784x128xf32, #tpu.memory_space<vmem>>, %arg3: memref<1x128xf32, #tpu.memory_space<vmem>>, %arg4: memref<128x128xf32, #tpu.memory_space<vmem>>, %arg5: memref<1x128xf32, #tpu.memory_space<vmem>>, %arg6: memref<128x128xf32, #tpu.memory_space<vmem>>, %arg7: memref<1x128xf32, #tpu.memory_space<vmem>>, %arg8: memref<128x784xf32, #tpu.memory_space<vmem>>, %arg9: memref<1x784xf32, #tpu.memory_space<vmem>>, %arg10: memref<8x784xf32, #tpu.memory_space<vmem>>, %arg11: memref<8x128xf32, #tpu.memory_space<vmem>>) attributes {dimension_semantics = [#tpu.dimension_semantics<parallel>], iteration_bounds = array<i64: 2>, scalar_prefetch = 0 : i64, scratch_operands = 0 : i64, tpu.core_type = #tpu.core_type<tc>, window_params = [{transform_indices = @transform_0, window_bounds = array<i64: 8, 784>}, {pipeline_mode = #tpu.pipeline_mode<synchronous>, transform_indices = @transform_1, window_bounds = array<i64: 784, 128>}, {pipeline_mode = #tpu.pipeline_mode<synchronous>, transform_indices = @transform_2, window_bounds = array<i64: 1, 128>}, {pipeline_mode = #tpu.pipeline_mode<synchronous>, transform_indices = @transform_3, window_bounds = array<i64: 128, 128>}, {pipeline_mode = #tpu.pipeline_mode<synchronous>, transform_indices = @transform_4, window_bounds = array<i64: 1, 128>}, {pipeline_mode = #tpu.pipeline_mode<synchronous>, transform_indices = @transform_5, window_bounds = array<i64: 128, 128>}, {pipeline_mode = #tpu.pipeline_mode<synchronous>, transform_indices = @transform_6, window_bounds = array<i64: 1, 128>}, {pipeline_mode = #tpu.pipeline_mode<synchronous>, transform_indices = @transform_7, window_bounds = array<i64: 128, 784>}, {pipeline_mode = #tpu.pipeline_mode<synchronous>, transform_indices = @transform_8, window_bounds = array<i64: 1, 784>}, {transform_indices = @transform_9, window_bounds = array<i64: 8, 784>}, {transform_indices = @transform_10, window_bounds = array<i64: 8, 128>}]} {
    %c0 = arith.constant 0 : index
    %c0_0 = arith.constant 0 : index
    %0 = vector.load %arg1[%c0, %c0_0] : memref<8x784xf32, #tpu.memory_space<vmem>>, vector<8x784xf32>
    %c0_1 = arith.constant 0 : index
    %c0_2 = arith.constant 0 : index
    %1 = vector.load %arg2[%c0_1, %c0_2] : memref<784x128xf32, #tpu.memory_space<vmem>>, vector<784x128xf32>
    %cst = arith.constant dense<0.000000e+00> : vector<8x128xf32>
    %2 = tpu.matmul %0, %1, %cst {dimension_numbers = #tpu.dot_dimension_numbers<[1], [0], [0], [1], [0, 0, 1, 1], [], []>} : vector<8x784xf32>, vector<784x128xf32>, vector<8x128xf32> -> vector<8x128xf32>
    %c0_3 = arith.constant 0 : index
    %c0_4 = arith.constant 0 : index
    %3 = vector.load %arg3[%c0_3, %c0_4] : memref<1x128xf32, #tpu.memory_space<vmem>>, vector<1x128xf32>
    %4 = vector.broadcast %3 : vector<1x128xf32> to vector<8x128xf32>
    %5 = arith.addf %2, %4 : vector<8x128xf32>
    %cst_5 = arith.constant 0.000000e+00 : f32
    %6 = vector.broadcast %cst_5 : f32 to vector<8x128xf32>
    %7 = arith.maximumf %5, %6 : vector<8x128xf32>
    %c0_6 = arith.constant 0 : index
    %c0_7 = arith.constant 0 : index
    %8 = vector.load %arg4[%c0_6, %c0_7] : memref<128x128xf32, #tpu.memory_space<vmem>>, vector<128x128xf32>
    %cst_8 = arith.constant dense<0.000000e+00> : vector<8x128xf32>
    %9 = tpu.matmul %7, %8, %cst_8 {dimension_numbers = #tpu.dot_dimension_numbers<[1], [0], [0], [1], [0, 0, 1, 1], [], []>} : vector<8x128xf32>, vector<128x128xf32>, vector<8x128xf32> -> vector<8x128xf32>
    %c0_9 = arith.constant 0 : index
    %c0_10 = arith.constant 0 : index
    %10 = vector.load %arg5[%c0_9, %c0_10] : memref<1x128xf32, #tpu.memory_space<vmem>>, vector<1x128xf32>
    %11 = vector.broadcast %10 : vector<1x128xf32> to vector<8x128xf32>
    %12 = arith.addf %9, %11 : vector<8x128xf32>
    %cst_11 = arith.constant 0.000000e+00 : f32
    %13 = vector.broadcast %cst_11 : f32 to vector<8x128xf32>
    %14 = arith.maximumf %12, %13 : vector<8x128xf32>
    %c0_12 = arith.constant 0 : index
    %c0_13 = arith.constant 0 : index
    %15 = vector.load %arg6[%c0_12, %c0_13] : memref<128x128xf32, #tpu.memory_space<vmem>>, vector<128x128xf32>
    %cst_14 = arith.constant dense<0.000000e+00> : vector<8x128xf32>
    %16 = tpu.matmul %14, %15, %cst_14 {dimension_numbers = #tpu.dot_dimension_numbers<[1], [0], [0], [1], [0, 0, 1, 1], [], []>} : vector<8x128xf32>, vector<128x128xf32>, vector<8x128xf32> -> vector<8x128xf32>
    %c0_15 = arith.constant 0 : index
    %c0_16 = arith.constant 0 : index
    %17 = vector.load %arg7[%c0_15, %c0_16] : memref<1x128xf32, #tpu.memory_space<vmem>>, vector<1x128xf32>
    %18 = vector.broadcast %17 : vector<1x128xf32> to vector<8x128xf32>
    %19 = arith.addf %16, %18 : vector<8x128xf32>
    %cst_17 = arith.constant 0.000000e+00 : f32
    %20 = vector.broadcast %cst_17 : f32 to vector<8x128xf32>
    %21 = arith.maximumf %19, %20 : vector<8x128xf32>
    %c0_18 = arith.constant 0 : index
    %c0_19 = arith.constant 0 : index
    %22 = vector.load %arg8[%c0_18, %c0_19] : memref<128x784xf32, #tpu.memory_space<vmem>>, vector<128x784xf32>
    %cst_20 = arith.constant dense<0.000000e+00> : vector<8x784xf32>
    %23 = tpu.matmul %21, %22, %cst_20 {dimension_numbers = #tpu.dot_dimension_numbers<[1], [0], [0], [1], [0, 0, 1, 1], [], []>} : vector<8x128xf32>, vector<128x784xf32>, vector<8x784xf32> -> vector<8x784xf32>
    %c0_21 = arith.constant 0 : index
    %c0_22 = arith.constant 0 : index
    %24 = vector.load %arg9[%c0_21, %c0_22] : memref<1x784xf32, #tpu.memory_space<vmem>>, vector<1x784xf32>
    %25 = vector.broadcast %24 : vector<1x784xf32> to vector<8x784xf32>
    %26 = arith.addf %23, %25 : vector<8x784xf32>
    %27 = arith.negf %26 : vector<8x784xf32>
    %28 = math.exp %27 : vector<8x784xf32>
    %cst_23 = arith.constant 1.000000e+00 : f32
    %29 = vector.broadcast %cst_23 : f32 to vector<8x784xf32>
    %30 = arith.addf %29, %28 : vector<8x784xf32>
    %31 = arith.divf %29, %30 : vector<8x784xf32>
    %c0_24 = arith.constant 0 : index
    %c0_25 = arith.constant 0 : index
    %32 = vector.load %arg10[%c0_24, %c0_25] : memref<8x784xf32, #tpu.memory_space<vmem>>, vector<8x784xf32>
    tpu.vector_store %arg10[%c0_24, %c0_25], %31 {strides = array<i32>} : memref<8x784xf32, #tpu.memory_space<vmem>>, vector<8x784xf32>,
    %c0_26 = arith.constant 0 : index
    %c0_27 = arith.constant 0 : index
    %33 = vector.load %arg11[%c0_26, %c0_27] : memref<8x128xf32, #tpu.memory_space<vmem>>, vector<8x128xf32>
    tpu.vector_store %arg11[%c0_26, %c0_27], %14 {strides = array<i32>} : memref<8x128xf32, #tpu.memory_space<vmem>>, vector<8x128xf32>,
    return
  }
  func.func @transform_0(%arg0: i32) -> (i32, i32) {
    %c0_i32 = arith.constant 0 : i32
    %c0_i32_0 = arith.constant 0 : i32
    return %arg0, %c0_i32 : i32, i32
  }
  func.func @transform_1(%arg0: i32) -> (i32, i32) {
    %c0_i32 = arith.constant 0 : i32
    %c0_i32_0 = arith.constant 0 : i32
    %c0_i32_1 = arith.constant 0 : i32
    return %c0_i32, %c0_i32_0 : i32, i32
  }
  func.func @transform_2(%arg0: i32) -> (i32, i32) {
    %c0_i32 = arith.constant 0 : i32
    %c0_i32_0 = arith.constant 0 : i32
    %c0_i32_1 = arith.constant 0 : i32
    return %c0_i32, %c0_i32_0 : i32, i32
  }
  func.func @transform_3(%arg0: i32) -> (i32, i32) {
    %c0_i32 = arith.constant 0 : i32
    %c0_i32_0 = arith.constant 0 : i32
    %c0_i32_1 = arith.constant 0 : i32
    return %c0_i32, %c0_i32_0 : i32, i32
  }
  func.func @transform_4(%arg0: i32) -> (i32, i32) {
    %c0_i32 = arith.constant 0 : i32
    %c0_i32_0 = arith.constant 0 : i32
    %c0_i32_1 = arith.constant 0 : i32
    return %c0_i32, %c0_i32_0 : i32, i32
  }
  func.func @transform_5(%arg0: i32) -> (i32, i32) {
    %c0_i32 = arith.constant 0 : i32
    %c0_i32_0 = arith.constant 0 : i32
    %c0_i32_1 = arith.constant 0 : i32
    return %c0_i32, %c0_i32_0 : i32, i32
  }
  func.func @transform_6(%arg0: i32) -> (i32, i32) {
    %c0_i32 = arith.constant 0 : i32
    %c0_i32_0 = arith.constant 0 : i32
    %c0_i32_1 = arith.constant 0 : i32
    return %c0_i32, %c0_i32_0 : i32, i32
  }
  func.func @transform_7(%arg0: i32) -> (i32, i32) {
    %c0_i32 = arith.constant 0 : i32
    %c0_i32_0 = arith.constant 0 : i32
    %c0_i32_1 = arith.constant 0 : i32
    return %c0_i32, %c0_i32_0 : i32, i32
  }
  func.func @transform_8(%arg0: i32) -> (i32, i32) {
    %c0_i32 = arith.constant 0 : i32
    %c0_i32_0 = arith.constant 0 : i32
    %c0_i32_1 = arith.constant 0 : i32
    return %c0_i32, %c0_i32_0 : i32, i32
  }
  func.func @transform_9(%arg0: i32) -> (i32, i32) {
    %c0_i32 = arith.constant 0 : i32
    %c0_i32_0 = arith.constant 0 : i32
    return %arg0, %c0_i32 : i32, i32
  }
  func.func @transform_10(%arg0: i32) -> (i32, i32) {
    %c0_i32 = arith.constant 0 : i32
    %c0_i32_0 = arith.constant 0 : i32
    return %arg0, %c0_i32 : i32, i32
  }
}

</mosaic_0001>

<bundles_post_ra>
// kernel: tpu_custom_call.1
= control target key start
LH: loop header
LB: loop body
LE: loop exit
PB: predicated region body
PF: predicated region fallthrough
CT: control target
= control target key end

     0   :  { %s2408_s0 = inlined_call_operand.vmem [shape: f32[16,784], index: 0, kind: input, shape index: {}]   ;;  %s2409_s1 = inlined_call_operand.vmem [shape: f32[784,128], index: 1, kind: input, shape index: {}]   ;;  %s2410_s2 = inlined_call_operand.vmem [shape: f32[1,128], index: 2, kind: input, shape index: {}]   ;;  %s2411_s3 = inlined_call_operand.vmem [shape: f32[128,128], index: 3, kind: input, shape index: {}]   ;;  %s2412_s4 = inlined_call_operand.vmem [shape: f32[1,128], index: 4, kind: input, shape index: {}]   ;;  %s2413_s5 = inlined_call_operand.vmem [shape: f32[128,128], index: 5, kind: input, shape index: {}]   ;;  %s2414_s6 = inlined_call_operand.vmem [shape: f32[1,128], index: 6, kind: input, shape index: {}]   ;;  %s2415_s7 = inlined_call_operand.vmem [shape: f32[128,784], index: 7, kind: input, shape index: {}]   ;;  %s2416_s8 = inlined_call_operand.vmem [shape: f32[1,784], index: 8, kind: input, shape index: {}]   ;;  %s2417_s9 = inlined_call_operand.hbm [shape: f32[16,784], index: 9, kind: output, shape index: {0}]   ;;  %s2418_s10 = inlined_call_operand.hbm [shape: f32[16,128], index: 10, kind: output, shape index: {1}]  }
   0x1   :  { %2419 = sst [smem:[#allocation9_spill]] %s2408_s0 }
   0x2   :  { %2420 = sst [smem:[#allocation10_spill]] %s2409_s1 }
   0x3   :  { %2421 = sst [smem:[#allocation11_spill]] %s2410_s2 }
   0x4   :  { %2422 = sst [smem:[#allocation12_spill]] %s2411_s3 }
   0x5   :  { %16 = vsyncpa [#allocation3], 0 }
   0x6   :  { %18 = vsyncpa [#allocation3 + $0x1], 0 }
   0x7   :  { %19 = vsyncpa [#allocation5], 0 }
   0x8   :  { %21 = vsyncpa [#allocation5 + $0x1], 0  ;;  %s1490_s13 = smov 0   ;;  %s1492_s14 = smov 0  }
   0x9   :  { %s1494_s15 = smov 0   ;;  %s1496_s16 = smov 0  }
   0xa LB: > { %s1511_s17 = sadd.s32 4294967295, %s1433_s16   ;;  %s1242_s18 = sadd.s32 4294967294, %s1433_s16   ;;  %s1433_s16 = sphi %s1496_s16, %s2436_s16   ;;  %s1429_s15 = sphi %s1494_s15, %s2435_s15   ;;  %s1425_s14 = sphi %s1492_s14, %s2434_s14   ;;  %s1421_s13 = sphi %s1490_s13, %s2433_s13  }
   0xb   : > { %s1515_s19 = sadd.s32 1, %s1433_s16   ;;  %s228_s20 = sadd.s32 1, %s1429_s15 }
   0xc   : > { %s225_s21 = ssub.s32 %s1433_s16, %s1515_s19  ;;  %p238_p0 = scmp.ne.s32.totalorder %s1429_s15, %s1425_s14 }
   0xd   : > { %p226_p1 = scmp.eq.s32.totalorder %s225_s21, 0  ;;  %p239_p2 = scmp.eq.s32.totalorder %s1511_s17, 1 }
   0xe   : > { %p244_p3 = scmp.ne.s32.totalorder %s1425_s14, %s1421_s13  ;;  %p245_p4 = scmp.eq.s32.totalorder %s1242_s18, 1 }
   0xf   : > { %s1526_s22 = scalar_select %p226_p1, %s1429_s15, %s228_s20  }
  0x10   : > { %p1528_p5 = por %p239_p2, %p238_p0  ;;  %p1532_p6 = por %p245_p4, %p244_p3 }
  0x11   : > { %2423 = sst [smem:[#allocation8_spill]] %s1526_s22  ;;  %p1245_p7 = scmp.ge.s32.totalorder %s1433_s16, 1 }
  0x12   : > { %p321_p8 = scmp.lt.s32.totalorder %s1433_s16, 3 }
  0x14   : > { %p322_p9 = pnand %p1245_p7, %p321_p8 }
  0x15   : > { %s2426_s1 = sld [smem:[#allocation10_spill]] (!%p322_p9)  ;;  %p364_p10 = scmp.lt.s32.totalorder (!%p322_p9), %s1511_s17, 1 }
  0x16   : > { %325 = sbr.rel (%p322_p9) target bundleno = 673 (0x2a1), region = 56  ;;  %s2427_s0 = sld [smem:[#allocation9_spill]] (!%p322_p9) }
  0x17   : > { %s2428_s3 = sld [smem:[#allocation12_spill]] (!%p322_p9)  ;;  %s2084_s30 = sand.u32 (!%p322_p9), 1, %s1425_s14  }
  0x18   : > { %s2429_s2 = sld [smem:[#allocation11_spill]] (!%p322_p9)  ;;  %s1246_s18 = sshll.u32 (!%p322_p9), %s2084_s30, 3 }
  0x19   : > { %s2141_s25 = scalar_lea.vmem (!%p322_p9), [#allocation4], %s1246_s18  ;;  %s1120_s26 = scalar_lea.sflag (!%p322_p9), [#allocation5], %s2084_s30 }
  0x1a   : > { %s1147_s22 = sshll.u32 (!%p322_p9), %s2141_s25, 4  ;;  %s1148_s22 = int_to_ptr.vmem [resolvable:$true] %s1147_s22 }
  0x1b   : > { %v391_v0 = vld [vmem:[%s2426_s1 + $0x78] sm:$0xff]  ;;  %v390_v1 = vld [vmem:[%s2426_s1 + $0x70] sm:$0xff]  ;;  %v389_v4 = vld [vmem:[%s2426_s1 + $0x68] sm:$0xff]  ;;  %s1695_s28 = scalar_select %p364_p10, %s1511_s17, 1  ;;  %vm478_vm0 = vcmask 130048  }
  0x1c   : > { %v407_v2 = vld [vmem:[%s2426_s1 + $0xf8] sm:$0xff]  ;;  %482 = vmatpush.msra.mxu0 %v391_v0  ;;  %v406_v3 = vld [vmem:[%s2426_s1 + $0xf0] sm:$0xff]  ;;  %v405_v5 = vld [vmem:[%s2426_s1 + $0xe8] sm:$0xff] }
  0x1d   : > { %502 = vmatpush.msra.mxu1 %v407_v2  ;;  %v388_v6 = vld [vmem:[%s2426_s1 + $0x60] sm:$0xff]  ;;  %v387_v8 = vld [vmem:[%s2426_s1 + $0x58] sm:$0xff]  ;;  %v386_v10 = vld [vmem:[%s2426_s1 + $0x50] sm:$0xff]  ;;  %s1262_s21 = smul.u32 56, %s1695_s28 }
  0x1e   : > { %483 = vmatpush.msra.mxu0 %v390_v1  ;;  %v404_v7 = vld [vmem:[%s2426_s1 + $0xe0] sm:$0xff]  ;;  %v403_v9 = vld [vmem:[%s2426_s1 + $0xd8] sm:$0xff]  ;;  %v402_v12 = vld [vmem:[%s2426_s1 + $0xd0] sm:$0xff] }
  0x1f   : > { %503 = vmatpush.msra.mxu1 %v406_v3  ;;  %v423_v11 = vld [vmem:[%s2426_s1 + $0x178] sm:$0xff]  ;;  %v422_v13 = vld [vmem:[%s2426_s1 + $0x170] sm:$0xff]  ;;  %v421_v15 = vld [vmem:[%s2426_s1 + $0x168] sm:$0xff]  ;;  %s1749_s28 = scalar_lea.vmem %s2427_s0, %s1262_s21  ;;  %s1258_s21 = sshll.u32 %s1511_s17, 3 }
  0x20   : > { %484 = vmatpush.msra.mxu0 %v389_v4  ;;  %522 = vmatpush.msra.mxu2 %v423_v11  ;;  %v439_v14 = vld [vmem:[%s2426_s1 + $0x1f8] sm:$0xff]  ;;  %v438_v16 = vld [vmem:[%s2426_s1 + $0x1f0] sm:$0xff]  ;;  %v385_v17 = vld [vmem:[%s2426_s1 + $0x48] sm:$0xff]  ;;  %s1145_s12 = scalar_lea.hbm %s2418_s10, %s1258_s21 }
  0x21   : > { %504 = vmatpush.msra.mxu1 %v405_v5  ;;  %v401_v18 = vld [vmem:[%s2426_s1 + $0xc8] sm:$0xff]  ;;  %542 = vmatpush.msra.mxu3 %v439_v14  ;;  %v420_v19 = vld [vmem:[%s2426_s1 + $0x160] sm:$0xff]  ;;  %v419_v23 = vld [vmem:[%s2426_s1 + $0x158] sm:$0xff]  ;;  %s1149_s20 = sshll.u32 %s1145_s12, 4  ;;  %s1150_s20 = int_to_ptr.hbm [resolvable:$true] %s1149_s20 }
  0x22   : > { %485 = vmatpush.msra.mxu0 %v388_v6  ;;  %523 = vmatpush.msra.mxu2 %v422_v13  ;;  %v437_v20 = vld [vmem:[%s2426_s1 + $0x1e8] sm:$0xff]  ;;  %v384_v21 = vld [vmem:[%s2426_s1 + $0x40] sm:$0xff]  ;;  %v383_v25 = vld [vmem:[%s2426_s1 + $0x38] sm:$0xff]  ;;  %s1353_s27 = sshra.s32 %s1150_s20, 4  ;;  %s1354_s27 = int_to_ptr.hbm [resolvable:$true] %s1353_s27 }
  0x23   : > { %505 = vmatpush.msra.mxu1 %v404_v7  ;;  %v400_v22 = vld [vmem:[%s2426_s1 + $0xc0] sm:$0xff]  ;;  %543 = vmatpush.msra.mxu3 %v438_v16  ;;  %v399_v26 = vld [vmem:[%s2426_s1 + $0xb8] sm:$0xff]  ;;  %v418_v27 = vld [vmem:[%s2426_s1 + $0x150] sm:$0xff]  ;;  %p1360_p0 = scmp.lt.s32.totalorder %s1354_s27, %s2418_s10 }
  0x24   : > { %486 = vmatpush.msra.mxu0 %v387_v8  ;;  %524 = vmatpush.msra.mxu2 %v421_v15  ;;  %v436_v24 = vld [vmem:[%s2426_s1 + $0x1e0] sm:$0xff]  ;;  %v435_v28 = vld [vmem:[%s2426_s1 + $0x1d8] sm:$0xff]  ;;  %v382_v29 = vld [vmem:[%s2426_s1 + $0x30] sm:$0xff] }
  0x25   : > { %506 = vmatpush.msra.mxu1 %v403_v9  ;;  %544 = vmatpush.msra.mxu3 %v437_v20  ;;  %v398_v30 = vld [vmem:[%s2426_s1 + $0xb0] sm:$0xff]  ;;  %v417_v31 = vld [vmem:[%s2426_s1 + $0x148] sm:$0xff]  ;;  %v416_v35 = vld [vmem:[%s2426_s1 + $0x140] sm:$0xff] }
  0x26   : > { %487 = vmatpush.msra.mxu0 %v386_v10  ;;  %525 = vmatpush.msra.mxu2 %v420_v19  ;;  %v434_v32 = vld [vmem:[%s2426_s1 + $0x1d0] sm:$0xff]  ;;  %v381_v33 = vld [vmem:[%s2426_s1 + $0x28] sm:$0xff]  ;;  %v380_v37 = vld [vmem:[%s2426_s1 + $0x20] sm:$0xff] }
  0x27   : > { %507 = vmatpush.msra.mxu1 %v402_v12  ;;  %545 = vmatpush.msra.mxu3 %v436_v24  ;;  %v397_v34 = vld [vmem:[%s2426_s1 + $0xa8] sm:$0xff]  ;;  %v396_v38 = vld [vmem:[%s2426_s1 + $0xa0] sm:$0xff]  ;;  %v415_v39 = vld [vmem:[%s2426_s1 + $0x138] sm:$0xff] }
  0x28   : > { %488 = vmatpush.msra.mxu0 %v385_v17  ;;  %526 = vmatpush.msra.mxu2 %v419_v23  ;;  %v433_v36 = vld [vmem:[%s2426_s1 + $0x1c8] sm:$0xff]  ;;  %v432_v40 = vld [vmem:[%s2426_s1 + $0x1c0] sm:$0xff]  ;;  %v379_v41 = vld [vmem:[%s2426_s1 + $0x18] sm:$0xff] }
  0x29   : > { %508 = vmatpush.msra.mxu1 %v401_v18  ;;  %546 = vmatpush.msra.mxu3 %v435_v28  ;;  %v395_v42 = vld [vmem:[%s2426_s1 + $0x98] sm:$0xff]  ;;  %v414_v43 = vld [vmem:[%s2426_s1 + $0x130] sm:$0xff]  ;;  %v413_v47 = vld [vmem:[%s2426_s1 + $0x128] sm:$0xff] }
  0x2a   : > { %489 = vmatpush.msra.mxu0 %v384_v21  ;;  %527 = vmatpush.msra.mxu2 %v418_v27  ;;  %v431_v44 = vld [vmem:[%s2426_s1 + $0x1b8] sm:$0xff]  ;;  %v378_v45 = vld [vmem:[%s2426_s1 + $0x10] sm:$0xff]  ;;  %v377_v49 = vld [vmem:[%s2426_s1 + $0x8] sm:$0xff] }
  0x2b   : > { %509 = vmatpush.msra.mxu1 %v400_v22  ;;  %547 = vmatpush.msra.mxu3 %v434_v32  ;;  %v394_v46 = vld [vmem:[%s2426_s1 + $0x90] sm:$0xff]  ;;  %v393_v50 = vld [vmem:[%s2426_s1 + $0x88] sm:$0xff]  ;;  %v412_v51 = vld [vmem:[%s2426_s1 + $0x120] sm:$0xff] }
  0x2c   : > { %490 = vmatpush.msra.mxu0 %v383_v25  ;;  %528 = vmatpush.msra.mxu2 %v417_v31  ;;  %v430_v48 = vld [vmem:[%s2426_s1 + $0x1b0] sm:$0xff]  ;;  %v429_v52 = vld [vmem:[%s2426_s1 + $0x1a8] sm:$0xff]  ;;  %v376_v53 = vld [vmem:[%s2426_s1] sm:$0xff] }
  0x2d   : > { %510 = vmatpush.msra.mxu1 %v399_v26  ;;  %548 = vmatpush.msra.mxu3 %v433_v36  ;;  %v392_v54 = vld [vmem:[%s2426_s1 + $0x80] sm:$0xff]  ;;  %v455_v55 = vld [vmem:[%s2426_s1 + $0x278] sm:$0xff]  ;;  %v454_v59 = vld [vmem:[%s2426_s1 + $0x270] sm:$0xff] }
  0x2e   : > { %491 = vmatpush.msra.mxu0 %v382_v29  ;;  %529 = vmatpush.msra.mxu2 %v416_v35  ;;  %v471_v56 = vld [vmem:[%s2426_s1 + $0x2f8] sm:$0xff]  ;;  %v428_v58 = vld [vmem:[%s2426_s1 + $0x1a0] sm:$0xff]  ;;  %v470_v60 = vld [vmem:[%s2426_s1 + $0x2f0] sm:$0xff] }
  0x2f   : > { %511 = vmatpush.msra.mxu1 %v398_v30  ;;  %549 = vmatpush.msra.mxu3 %v432_v40  ;;  %v411_v57 = vld [vmem:[%s2426_s1 + $0x118] sm:$0xff]  ;;  %v410_v61 = vld [vmem:[%s2426_s1 + $0x110] sm:$0xff]  ;;  %v453_v63 = vld [vmem:[%s2426_s1 + $0x268] sm:$0xff] }
  0x30   : > { %492 = vmatpush.msra.mxu0 %v381_v33  ;;  %530 = vmatpush.msra.mxu2 %v415_v39  ;;  %v427_v62 = vld [vmem:[%s2426_s1 + $0x198] sm:$0xff]  ;;  %v469_v0 = vld [vmem:[%s2426_s1 + $0x2e8] sm:$0xff]  ;;  %v426_v2 = vld [vmem:[%s2426_s1 + $0x190] sm:$0xff] }
  0x31   : > { %512 = vmatpush.msra.mxu1 %v397_v34  ;;  %550 = vmatpush.msra.mxu3 %v431_v44  ;;  %v409_v1 = vld [vmem:[%s2426_s1 + $0x108] sm:$0xff]  ;;  %v452_v3 = vld [vmem:[%s2426_s1 + $0x260] sm:$0xff]  ;;  %v451_v5 = vld [vmem:[%s2426_s1 + $0x258] sm:$0xff] }
  0x32   : > { %493 = vmatpush.msra.mxu0 %v380_v37  ;;  %531 = vmatpush.msra.mxu2 %v414_v43  ;;  %v468_v4 = vld [vmem:[%s2426_s1 + $0x2e0] sm:$0xff]  ;;  %v425_v7 = vld [vmem:[%s2426_s1 + $0x188] sm:$0xff]  ;;  %v467_v8 = vld [vmem:[%s2426_s1 + $0x2d8] sm:$0xff] }
  0x33   : > { %513 = vmatpush.msra.mxu1 %v396_v38  ;;  %551 = vmatpush.msra.mxu3 %v430_v48  ;;  %v408_v6 = vld [vmem:[%s2426_s1 + $0x100] sm:$0xff]  ;;  %v371_v9 = vld [vmem:[%s1749_s28 + $0x10] sm:$0xff]  ;;  %v473_v13 = vld [vmem:[%s2426_s1 + $0x308] sm:$0xff] }
  0x34   : > { %494 = vmatpush.msra.mxu0 %v379_v41  ;;  %532 = vmatpush.msra.mxu2 %v413_v47  ;;  %v424_v10 = vld [vmem:[%s2426_s1 + $0x180] sm:$0xff]  ;;  %v450_v11 = vld [vmem:[%s2426_s1 + $0x250] sm:$0xff]  ;;  %v449_v15 = vld [vmem:[%s2426_s1 + $0x248] sm:$0xff] }
  0x35   : > { %514 = vmatpush.msra.mxu1 %v395_v42  ;;  %552 = vmatpush.msra.mxu3 %v429_v52  ;;  %v466_v12 = vld [vmem:[%s2426_s1 + $0x2d0] sm:$0xff]  ;;  %v369_v14 = vld [vmem:[%s1749_s28] sm:$0xff]  ;;  %v465_v16 = vld [vmem:[%s2426_s1 + $0x2c8] sm:$0xff] }
  0x36   : > { %495 = vmatpush.msra.mxu0 %v378_v45  ;;  %533 = vmatpush.msra.mxu2 %v412_v51  ;;  %v372_v17 = vld [vmem:[%s1749_s28 + $0x18] sm:$0xff]  ;;  %v370_v18 = vld [vmem:[%s1749_s28 + $0x8] sm:$0xff]  ;;  %v448_v19 = vld [vmem:[%s2426_s1 + $0x240] sm:$0xff] }
  0x37   : > { %515 = vmatpush.msra.mxu1 %v394_v46  ;;  %553 = vmatpush.msra.mxu3 %v428_v58  ;;  %v464_v20 = vld [vmem:[%s2426_s1 + $0x2c0] sm:$0xff]  ;;  %v638_v22 = vld [vmem:[%s2428_s3 + $0x78] sm:$0xff]  ;;  %v375_v25 = vld [vmem:[%s1749_s28 + $0x30] sm:$0xff] }
  0x38   : > { %496 = vmatpush.msra.mxu0 %v377_v49  ;;  %534 = vmatpush.msra.mxu2 %v411_v57  ;;  %v472_v21 = vld [vmem:[%s2426_s1 + $0x300] sm:$0xff]  ;;  %v447_v23 = vld [vmem:[%s2426_s1 + $0x238] sm:$0xff]  ;;  %v637_v26 = vld [vmem:[%s2428_s3 + $0x70] sm:$0xff] }
  0x39   : > { %516 = vmatpush.msra.mxu1 %v393_v50  ;;  %554 = vmatpush.msra.mxu3 %v427_v62  ;;  %v463_v24 = vld [vmem:[%s2426_s1 + $0x2b8] sm:$0xff]  ;;  %v446_v27 = vld [vmem:[%s2426_s1 + $0x230] sm:$0xff]  ;;  %v636_v29 = vld [vmem:[%s2428_s3 + $0x68] sm:$0xff] }
  0x3a   : > { %497 = vmatpush.msra.mxu0 %v376_v53  ;;  %535 = vmatpush.msra.mxu2 %v410_v61  ;;  %v462_v28 = vld [vmem:[%s2426_s1 + $0x2b0] sm:$0xff]  ;;  %v445_v30 = vld [vmem:[%s2426_s1 + $0x228] sm:$0xff]  ;;  %v635_v32 = vld [vmem:[%s2428_s3 + $0x60] sm:$0xff] }
  0x3b   : > { %517 = vmatpush.msra.mxu1 %v392_v54  ;;  %555 = vmatpush.msra.mxu3 %v426_v2  ;;  %v461_v31 = vld [vmem:[%s2426_s1 + $0x2a8] sm:$0xff]  ;;  %v444_v33 = vld [vmem:[%s2426_s1 + $0x220] sm:$0xff]  ;;  %v634_v35 = vld [vmem:[%s2428_s3 + $0x58] sm:$0xff] }
  0x3c   : > { %562 = vmatpush.msrb.mxu0 %v455_v55  ;;  %536 = vmatpush.msra.mxu2 %v409_v1  ;;  %v460_v34 = vld [vmem:[%s2426_s1 + $0x2a0] sm:$0xff]  ;;  %v443_v36 = vld [vmem:[%s2426_s1 + $0x218] sm:$0xff]  ;;  %v633_v38 = vld [vmem:[%s2428_s3 + $0x50] sm:$0xff] }
  0x3d   : > { %582 = vmatpush.msrb.mxu1 %v471_v56  ;;  %556 = vmatpush.msra.mxu3 %v425_v7  ;;  %v459_v37 = vld [vmem:[%s2426_s1 + $0x298] sm:$0xff]  ;;  %v442_v39 = vld [vmem:[%s2426_s1 + $0x210] sm:$0xff]  ;;  %v632_v41 = vld [vmem:[%s2428_s3 + $0x48] sm:$0xff] }
  0x3e   : > { %563 = vmatpush.msrb.mxu0 %v454_v59  ;;  %537 = vmatpush.msra.mxu2 %v408_v6  ;;  %v458_v40 = vld [vmem:[%s2426_s1 + $0x290] sm:$0xff]  ;;  %v441_v42 = vld [vmem:[%s2426_s1 + $0x208] sm:$0xff]  ;;  %v440_v44 = vld [vmem:[%s2426_s1 + $0x200] sm:$0xff] }
  0x3f   : > { %583 = vmatpush.msrb.mxu1 %v470_v60  ;;  %538 = vmatmul.f32.vlgmr.msra.gmra.mxu2 %v371_v9  ;;  %v457_v43 = vld [vmem:[%s2426_s1 + $0x288] sm:$0xff]  ;;  %v456_v45 = vld [vmem:[%s2426_s1 + $0x280] sm:$0xff]  ;;  %v630_v49 = vld [vmem:[%s2428_s3 + $0x38] sm:$0xff]  ;;  %s1359_s1 = scalar_lea.hbm %s2418_s10, 16 }
  0x40   : > { %564 = vmatpush.msrb.mxu0 %v453_v63  ;;  %557 = vmatpush.msra.mxu3 %v424_v10  ;;  %v373_v46 = vld [vmem:[%s1749_s28 + $0x20] sm:$0xff]  ;;  %v374_v47 = vld [vmem:[%s1749_s28 + $0x28] sm:$0xff]  ;;  %v629_v50 = vld [vmem:[%s2428_s3 + $0x30] sm:$0xff]  ;;  %s1355_s28 = scalar_lea.hbm %s1354_s27, 8 }
  0x41   : > { %584 = vmatpush.msrb.mxu1 %v469_v0  ;;  %616 = vmatpush.msrb.mxu2 %v473_v13  ;;  %v631_v48 = vld [vmem:[%s2428_s3 + $0x40] sm:$0xff]  ;;  %v628_v51 = vld [vmem:[%s2428_s3 + $0x28] sm:$0xff]  ;;  %v626_v53 = vld [vmem:[%s2428_s3 + $0x18] sm:$0xff]  ;;  %p1356_p11 = scmp.ne.s32.totalorder %s1354_s27, %s1355_s28  ;;  %p1361_p1 = scmp.lt.s32.totalorder %s1359_s1, %s1355_s28 }
  0x42   : > { %565 = vmatpush.msrb.mxu0 %v452_v3  ;;  %558 = vmatmul.f32.vlgmr.msra.gmra.mxu3 %v372_v17  ;;  %v627_v52 = vld [vmem:[%s2428_s3 + $0x20] sm:$0xff]  ;;  %v625_v54 = vld [vmem:[%s2428_s3 + $0x10] sm:$0xff]  ;;  %v624_v55 = vld [vmem:[%s2428_s3 + $0x8] sm:$0xff] }
  0x43   : > { %585 = vmatpush.msrb.mxu1 %v468_v4  ;;  %498 = vmatmul.f32.vlgmr.msra.gmra.mxu0 %v369_v14  ;;  %v623_v56 = vld [vmem:[%s2428_s3] sm:$0xff]  ;;  %v679_v57 = vld [vmem:[%s2413_s5 + $0x78] sm:$0xff]  ;;  %v678_v58 = vld [vmem:[%s2413_s5 + $0x70] sm:$0xff]  ;;  %p1357_p12 = pnand %p1356_p11, %p1528_p5  ;;  %p1362_p2 = por %p1361_p1, %p1360_p0 }
  0x44   : > { %566 = vmatpush.msrb.mxu0 %v451_v5  ;;  %518 = vmatmul.f32.vlgmr.msra.gmra.mxu1 %v370_v18  ;;  %v677_v59 = vld [vmem:[%s2413_s5 + $0x68] sm:$0xff]  ;;  %v1308_v60 = vld [vmem:[%s2429_s2] ss:$0 sm:$0xff]  ;;  %v675_v63 = vld [vmem:[%s2413_s5 + $0x58] sm:$0xff] }
  0x45   : > { %586 = vmatpush.msrb.mxu1 %v467_v8  ;;  %617 = vmatpush.msrb.mxu2 %v472_v21  ;;  %v676_v61 = vld [vmem:[%s2413_s5 + $0x60] sm:$0xff]  ;;  %v674_v1 = vld [vmem:[%s2413_s5 + $0x50] sm:$0xff]  ;;  %v673_v3 = vld [vmem:[%s2413_s5 + $0x48] sm:$0xff]  ;;  %p1358_p13 = pneg %p1357_p12 }
  0x46   : > { %567 = vmatpush.msrb.mxu0 %v450_v11  ;;  %643 = vmatpush.msrb.mxu3 %v638_v22  ;;  %v672_v5 = vld [vmem:[%s2413_s5 + $0x40] sm:$0xff]  ;;  %v671_v7 = vld [vmem:[%s2413_s5 + $0x38] sm:$0xff]  ;;  %v670_v9 = vld [vmem:[%s2413_s5 + $0x30] sm:$0xff] }
  0x47   : > { %587 = vmatpush.msrb.mxu1 %v466_v12  ;;  %1248 = vmatmul.msk.f32.vlgmr.msrb.gmra.mxu2 %vm478_vm0, %v375_v25  ;;  %v669_v11 = vld [vmem:[%s2413_s5 + $0x28] sm:$0xff]  ;;  %v668_v13 = vld [vmem:[%s2413_s5 + $0x20] sm:$0xff]  ;;  %v667_v14 = vld [vmem:[%s2413_s5 + $0x18] sm:$0xff]  ;;  %p1363_p3 = pnand %p1362_p2, %p1358_p13 }
  0x48   : > { %568 = vmatpush.msrb.mxu0 %v449_v15  ;;  %644 = vmatpush.msrb.mxu3 %v637_v26  ;;  %v666_v22 = vld [vmem:[%s2413_s5 + $0x10] sm:$0xff]  ;;  %v810_v25 = vld [vmem:[%s2415_s7 + $0x348] sm:$0xff] }
  0x49   : > { %588 = vmatpush.msrb.mxu1 %v465_v16  ;;  %684 = vmatpush.msra.mxu2 %v679_v57  ;;  %v811_v26 = vld [vmem:[%s2415_s7 + $0x350] sm:$0xff]  ;;  %v749_v57 = vld [vmem:[%s2415_s7 + $0x160] sm:$0xff] }
  0x4a   : > { %569 = vmatpush.msrb.mxu0 %v448_v19  ;;  %645 = vmatpush.msrb.mxu3 %v636_v29  ;;  %v804_v29 = vld [vmem:[%s2415_s7 + $0x318] sm:$0xff] }
  0x4b   : > { %589 = vmatpush.msrb.mxu1 %v464_v20  ;;  %685 = vmatpush.msra.mxu2 %v678_v58  ;;  %v792_v58 = vld [vmem:[%s2415_s7 + $0x2b8] sm:$0xff] }
  0x4c   : > { %570 = vmatpush.msrb.mxu0 %v447_v23  ;;  %646 = vmatpush.msrb.mxu3 %v635_v32  ;;  %v665_v23 = vld [vmem:[%s2413_s5 + $0x8] sm:$0xff]  ;;  %v797_v32 = vld [vmem:[%s2415_s7 + $0x2e0] sm:$0xff] }
  0x4d   : > { %590 = vmatpush.msrb.mxu1 %v463_v24  ;;  %686 = vmatpush.msra.mxu2 %v677_v59  ;;  %v664_v24 = vld [vmem:[%s2413_s5] sm:$0xff]  ;;  %v740_v59 = vld [vmem:[%s2415_s7 + $0x118] sm:$0xff] }
  0x4e   : > { %571 = vmatpush.msrb.mxu0 %v446_v27  ;;  %647 = vmatpush.msrb.mxu3 %v634_v35  ;;  %v812_v27 = vld [vmem:[%s2415_s7 + $0x358] sm:$0xff]  ;;  %v790_v35 = vld [vmem:[%s2415_s7 + $0x2a8] sm:$0xff] }
  0x4f   : > { %591 = vmatpush.msrb.mxu1 %v462_v28  ;;  %687 = vmatpush.msra.mxu2 %v676_v61  ;;  %v803_v28 = vld [vmem:[%s2415_s7 + $0x310] sm:$0xff]  ;;  %v742_v61 = vld [vmem:[%s2415_s7 + $0x128] sm:$0xff] }
  0x50   : > { %572 = vmatpush.msrb.mxu0 %v445_v30  ;;  %648 = vmatpush.msrb.mxu3 %v633_v38  ;;  %v805_v30 = vld [vmem:[%s2415_s7 + $0x320] sm:$0xff]  ;;  %v783_v38 = vld [vmem:[%s2415_s7 + $0x270] sm:$0xff] }
  0x51   : > { %592 = vmatpush.msrb.mxu1 %v461_v31  ;;  %688 = vmatpush.msra.mxu2 %v675_v63  ;;  %v796_v31 = vld [vmem:[%s2415_s7 + $0x2d8] sm:$0xff]  ;;  %v733_v63 = vld [vmem:[%s2415_s7 + $0xe0] sm:$0xff] }
  0x52   : > { %573 = vmatpush.msrb.mxu0 %v444_v33  ;;  %649 = vmatpush.msrb.mxu3 %v632_v41  ;;  %v798_v33 = vld [vmem:[%s2415_s7 + $0x2e8] sm:$0xff]  ;;  %v776_v41 = vld [vmem:[%s2415_s7 + $0x238] sm:$0xff] }
  0x53   : > { %593 = vmatpush.msrb.mxu1 %v460_v34  ;;  %689 = vmatpush.msra.mxu2 %v674_v1  ;;  %v789_v34 = vld [vmem:[%s2415_s7 + $0x2a0] sm:$0xff]  ;;  %v735_v1 = vld [vmem:[%s2415_s7 + $0xf0] sm:$0xff] }
  0x54   : > { %574 = vmatpush.msrb.mxu0 %v443_v36  ;;  %650 = vmatpush.msrb.mxu3 %v631_v48  ;;  %v791_v36 = vld [vmem:[%s2415_s7 + $0x2b0] sm:$0xff]  ;;  %v813_v48 = vld [vmem:[%s2415_s7 + $0x360] sm:$0xff] }
  0x55   : > { %594 = vmatpush.msrb.mxu1 %v459_v37  ;;  %690 = vmatpush.msra.mxu2 %v673_v3  ;;  %v782_v37 = vld [vmem:[%s2415_s7 + $0x268] sm:$0xff] }
  0x56   : > { %575 = vmatpush.msrb.mxu0 %v442_v39  ;;  %651 = vmatpush.msrb.mxu3 %v630_v49  ;;  %v784_v39 = vld [vmem:[%s2415_s7 + $0x278] sm:$0xff]  ;;  %v763_v49 = vld [vmem:[%s2415_s7 + $0x1d0] sm:$0xff]  ;;  %v726_v3 = vld [vmem:[%s2415_s7 + $0xa8] sm:$0xff] }
  0x57   : > { %595 = vmatpush.msrb.mxu1 %v458_v40  ;;  %691 = vmatpush.msra.mxu2 %v672_v5  ;;  %v775_v40 = vld [vmem:[%s2415_s7 + $0x230] sm:$0xff]  ;;  %v728_v5 = vld [vmem:[%s2415_s7 + $0xb8] sm:$0xff] }
  0x58   : > { %576 = vmatpush.msrb.mxu0 %v441_v42  ;;  %652 = vmatpush.msrb.mxu3 %v629_v50  ;;  %v777_v42 = vld [vmem:[%s2415_s7 + $0x240] sm:$0xff]  ;;  %v806_v50 = vld [vmem:[%s2415_s7 + $0x328] sm:$0xff] }
  0x59   : > { %596 = vmatpush.msrb.mxu1 %v457_v43  ;;  %692 = vmatpush.msra.mxu2 %v671_v7  ;;  %v768_v43 = vld [vmem:[%s2415_s7 + $0x1f8] sm:$0xff]  ;;  %v1309_v7 = vld [vmem:[%s2412_s4] ss:$0 sm:$0xff] }
  0x5a   : > { %577 = vmatpush.msrb.mxu0 %v440_v44  ;;  %653 = vmatpush.msrb.mxu3 %v628_v51  ;;  %v769_v44 = vld [vmem:[%s2415_s7 + $0x200] sm:$0xff]  ;;  %v754_v51 = vld [vmem:[%s2415_s7 + $0x188] sm:$0xff] }
  0x5b   : > { %597 = vmatpush.msrb.mxu1 %v456_v45  ;;  %578 = vmatmul.f32.vlgmr.msrb.gmra.mxu0 %v373_v46  ;;  %v770_v45 = vld [vmem:[%s2415_s7 + $0x208] sm:$0xff]  ;;  %v761_v46 = vld [vmem:[%s2415_s7 + $0x1c0] sm:$0xff] }
  0x5c   : > { %598 = vmatmul.f32.vlgmr.msrb.gmra.mxu1 %v374_v47  ;;  %654 = vmatpush.msrb.mxu3 %v627_v52  ;;  %v762_v47 = vld [vmem:[%s2415_s7 + $0x1c8] sm:$0xff]  ;;  %v755_v52 = vld [vmem:[%s2415_s7 + $0x190] sm:$0xff] }
  0x5d   : > { %693 = vmatpush.msra.mxu2 %v670_v9  ;;  %833 = vmatpush.msra.mxu0 %v810_v25  ;;  %v720_v9 = vld [vmem:[%s2415_s7 + $0x78] sm:$0xff]  ;;  %v750_v25 = vld [vmem:[%s2415_s7 + $0x168] sm:$0xff] }
  0x5e   : > { %655 = vmatpush.msrb.mxu3 %v626_v53  ;;  %853 = vmatpush.msra.mxu1 %v811_v26  ;;  %v756_v53 = vld [vmem:[%s2415_s7 + $0x198] sm:$0xff]  ;;  %v807_v26 = vld [vmem:[%s2415_s7 + $0x330] sm:$0xff] }
  0x5f   : > { %694 = vmatpush.msra.mxu2 %v669_v11  ;;  %834 = vmatpush.msra.mxu0 %v803_v28  ;;  %v764_v11 = vld [vmem:[%s2415_s7 + $0x1d8] sm:$0xff]  ;;  %v809_v28 = vld [vmem:[%s2415_s7 + $0x340] sm:$0xff] }
  0x60   : > { %656 = vmatpush.msrb.mxu3 %v625_v54  ;;  %854 = vmatpush.msra.mxu1 %v804_v29  ;;  %v799_v54 = vld [vmem:[%s2415_s7 + $0x2f0] sm:$0xff] }
  0x61   : > { %695 = vmatpush.msra.mxu2 %v668_v13  ;;  %835 = vmatpush.msra.mxu0 %v796_v31  ;;  %v713_v13 = vld [vmem:[%s2415_s7 + $0x40] sm:$0xff]  ;;  %v743_v29 = vld [vmem:[%s2415_s7 + $0x130] sm:$0xff] }
  0x62   : > { %657 = vmatpush.msrb.mxu3 %v624_v55  ;;  %855 = vmatpush.msra.mxu1 %v797_v32  ;;  %v747_v55 = vld [vmem:[%s2415_s7 + $0x150] sm:$0xff]  ;;  %v801_v31 = vld [vmem:[%s2415_s7 + $0x300] sm:$0xff]  ;;  %v802_v32 = vld [vmem:[%s2415_s7 + $0x308] sm:$0xff] }
  0x63   : > { %696 = vmatpush.msra.mxu2 %v667_v14  ;;  %836 = vmatpush.msra.mxu0 %v789_v34  ;;  %v793_v34 = vld [vmem:[%s2415_s7 + $0x2c0] sm:$0xff] }
  0x64   : > { %658 = vmatpush.msrb.mxu3 %v623_v56  ;;  %856 = vmatpush.msra.mxu1 %v790_v35  ;;  %v748_v56 = vld [vmem:[%s2415_s7 + $0x158] sm:$0xff]  ;;  %v794_v35 = vld [vmem:[%s2415_s7 + $0x2c8] sm:$0xff] }
  0x65   : > { %697 = vmatpush.msra.mxu2 %v666_v22  ;;  %837 = vmatpush.msra.mxu0 %v782_v37  ;;  %v814_v22 = vld [vmem:[%s2415_s7 + $0x368] sm:$0xff]  ;;  %v729_v37 = vld [vmem:[%s2415_s7 + $0xc0] sm:$0xff] }
  0x66   : > { %873 = vmatpush.msra.mxu3 %v812_v27  ;;  %857 = vmatpush.msra.mxu1 %v783_v38  ;;  %v808_v27 = vld [vmem:[%s2415_s7 + $0x338] sm:$0xff]  ;;  %v786_v38 = vld [vmem:[%s2415_s7 + $0x288] sm:$0xff] }
  0x67   : > { %698 = vmatpush.msra.mxu2 %v665_v23  ;;  %838 = vmatpush.msra.mxu0 %v775_v40  ;;  %v815_v23 = vld [vmem:[%s2415_s7 + $0x370] sm:$0xff]  ;;  %v788_v40 = vld [vmem:[%s2415_s7 + $0x298] sm:$0xff] }
  0x68   : > { %874 = vmatpush.msra.mxu3 %v805_v30  ;;  %858 = vmatpush.msra.mxu1 %v776_v41  ;;  %v800_v30 = vld [vmem:[%s2415_s7 + $0x2f8] sm:$0xff]  ;;  %v779_v41 = vld [vmem:[%s2415_s7 + $0x250] sm:$0xff] }
  0x69   : > { %699 = vmatpush.msra.mxu2 %v664_v24  ;;  %839 = vmatpush.msra.mxu0 %v768_v43  ;;  %v816_v24 = vld [vmem:[%s2415_s7 + $0x378] sm:$0xff]  ;;  %v781_v43 = vld [vmem:[%s2415_s7 + $0x260] sm:$0xff] }
  0x6a   : > { %875 = vmatpush.msra.mxu3 %v798_v33  ;;  %859 = vmatpush.msra.mxu1 %v769_v44  ;;  %v736_v33 = vld [vmem:[%s2415_s7 + $0xf8] sm:$0xff] }
  0x6b   : > { %893 = vmatpush.msrb.mxu2 %v813_v48  ;;  %840 = vmatpush.msra.mxu0 %v761_v46  ;;  %v772_v44 = vld [vmem:[%s2415_s7 + $0x218] sm:$0xff]  ;;  %v774_v46 = vld [vmem:[%s2415_s7 + $0x228] sm:$0xff] }
  0x6c   : > { %876 = vmatpush.msra.mxu3 %v791_v36  ;;  %860 = vmatpush.msra.mxu1 %v762_v47  ;;  %v795_v36 = vld [vmem:[%s2415_s7 + $0x2d0] sm:$0xff]  ;;  %v765_v47 = vld [vmem:[%s2415_s7 + $0x1e0] sm:$0xff]  ;;  %v766_v48 = vld [vmem:[%s2415_s7 + $0x1e8] sm:$0xff] }
  0x6d   : > { %894 = vmatpush.msrb.mxu2 %v806_v50  ;;  %841 = vmatpush.msra.mxu0 %v754_v51  ;;  %v758_v50 = vld [vmem:[%s2415_s7 + $0x1a8] sm:$0xff]  ;;  %v759_v51 = vld [vmem:[%s2415_s7 + $0x1b0] sm:$0xff] }
  0x6e   : > { %877 = vmatpush.msra.mxu3 %v784_v39  ;;  %861 = vmatpush.msra.mxu1 %v755_v52  ;;  %v787_v39 = vld [vmem:[%s2415_s7 + $0x290] sm:$0xff]  ;;  %v760_v52 = vld [vmem:[%s2415_s7 + $0x1b8] sm:$0xff] }
  0x6f   : > { %895 = vmatpush.msrb.mxu2 %v799_v54  ;;  %842 = vmatpush.msra.mxu0 %v747_v55  ;;  %v751_v54 = vld [vmem:[%s2415_s7 + $0x170] sm:$0xff]  ;;  %v752_v55 = vld [vmem:[%s2415_s7 + $0x178] sm:$0xff] }
  0x70   : > { %878 = vmatpush.msra.mxu3 %v777_v42  ;;  %862 = vmatpush.msra.mxu1 %v748_v56  ;;  %v780_v42 = vld [vmem:[%s2415_s7 + $0x258] sm:$0xff]  ;;  %v753_v56 = vld [vmem:[%s2415_s7 + $0x180] sm:$0xff] }
  0x71   : > { %896 = vmatpush.msrb.mxu2 %v792_v58  ;;  %843 = vmatpush.msra.mxu0 %v740_v59  ;;  %v744_v58 = vld [vmem:[%s2415_s7 + $0x138] sm:$0xff]  ;;  %v745_v59 = vld [vmem:[%s2415_s7 + $0x140] sm:$0xff] }
  0x72   : > { %879 = vmatpush.msra.mxu3 %v770_v45  ;;  %v773_v45 = vld [vmem:[%s2415_s7 + $0x220] sm:$0xff] }
  0x73   : > { %844 = vmatpush.msra.mxu0 %v733_v63  ;;  %v738_v63 = vld [vmem:[%s2415_s7 + $0x108] sm:$0xff] }
  0x74   : > { %880 = vmatpush.msra.mxu3 %v763_v49  ;;  %v767_v49 = vld [vmem:[%s2415_s7 + $0x1f0] sm:$0xff] }
  0x75   : > { %845 = vmatpush.msra.mxu0 %v726_v3  ;;  %v732_v3 = vld [vmem:[%s2415_s7 + $0xd8] sm:$0xff] }
  0x76   : > { %881 = vmatpush.msra.mxu3 %v756_v53  ;;  %v722_v53 = vld [vmem:[%s2415_s7 + $0x88] sm:$0xff] }
  0x78   : > { %882 = vmatpush.msra.mxu3 %v749_v57  ;;  %v715_v57 = vld [vmem:[%s2415_s7 + $0x50] sm:$0xff] }
  0x7a   : > { %883 = vmatpush.msra.mxu3 %v742_v61  ;;  %v708_v61 = vld [vmem:[%s2415_s7 + $0x18] sm:$0xff] }
  0x7c   : > { %884 = vmatpush.msra.mxu3 %v735_v1  ;;  %v730_v1 = vld [vmem:[%s2415_s7 + $0xc8] sm:$0xff] }
  0x7e   : > { %885 = vmatpush.msra.mxu3 %v728_v5  ;;  %v724_v5 = vld [vmem:[%s2415_s7 + $0x98] sm:$0xff] }
  0xc0   : > { %v499_v62 = vpop.f32.mrf.mxu0 }
  0xc1   : > { %v500_v0 = vadd.f32 %v1308_v60, %v499_v62  ;;  %v519_v2 = vpop.f32.mrf.mxu1  ;;  %v741_v60 = vld [vmem:[%s2415_s7 + $0x120] sm:$0xff] }
  0xc2   : > { %v539_v6 = vpop.f32.mrf.mxu2  ;;  %v785_v62 = vld [vmem:[%s2415_s7 + $0x280] sm:$0xff]  ;;  %863 = vmatpush.msra.mxu1 %v741_v60  ;;  %v746_v60 = vld [vmem:[%s2415_s7 + $0x148] sm:$0xff] }
  0xc3   : > { %v520_v4 = vadd.f32 %v519_v2, %v500_v0  ;;  %v734_v0 = vld [vmem:[%s2415_s7 + $0xe8] sm:$0xff]  ;;  %897 = vmatpush.msrb.mxu2 %v785_v62  ;;  %v737_v62 = vld [vmem:[%s2415_s7 + $0x100] sm:$0xff] }
  0xc4   : > { %v778_v2 = vld [vmem:[%s2415_s7 + $0x248] sm:$0xff]  ;;  %864 = vmatpush.msra.mxu1 %v734_v0  ;;  %v739_v0 = vld [vmem:[%s2415_s7 + $0x110] sm:$0xff] }
  0xc5   : > { %v540_v8 = vadd.f32 %v539_v6, %v520_v4  ;;  %v559_v10 = vpop.f32.mrf.mxu3  ;;  %v727_v4 = vld [vmem:[%s2415_s7 + $0xb0] sm:$0xff]  ;;  %898 = vmatpush.msrb.mxu2 %v778_v2 }
  0xc6   : > { %v771_v6 = vld [vmem:[%s2415_s7 + $0x210] sm:$0xff]  ;;  %865 = vmatpush.msra.mxu1 %v727_v4 }
  0xc7   : > { %v560_v12 = vadd.f32 %v559_v10, %v540_v8  ;;  %v719_v8 = vld [vmem:[%s2415_s7 + $0x70] sm:$0xff]  ;;  %v721_v10 = vld [vmem:[%s2415_s7 + $0x80] sm:$0xff]  ;;  %899 = vmatpush.msrb.mxu2 %v771_v6 }
  0xc8   : > { %846 = vmatpush.msra.mxu0 %v719_v8  ;;  %866 = vmatpush.msra.mxu1 %v720_v9  ;;  %v731_v2 = vld [vmem:[%s2415_s7 + $0xd0] sm:$0xff]  ;;  %v725_v6 = vld [vmem:[%s2415_s7 + $0xa0] sm:$0xff]  ;;  %v718_v9 = vld [vmem:[%s2415_s7 + $0x68] sm:$0xff] }
  0xc9   : > { %886 = vmatpush.msra.mxu3 %v721_v10  ;;  %900 = vmatpush.msrb.mxu2 %v764_v11  ;;  %v723_v4 = vld [vmem:[%s2415_s7 + $0x90] sm:$0xff]  ;;  %v717_v8 = vld [vmem:[%s2415_s7 + $0x60] sm:$0xff]  ;;  %v710_v11 = vld [vmem:[%s2415_s7 + $0x28] sm:$0xff] }
  0xca   : > { %v619_v18 = vpop.f32.mrf.mxu2  ;;  %867 = vmatpush.msra.mxu1 %v713_v13  ;;  %v709_v10 = vld [vmem:[%s2415_s7 + $0x20] sm:$0xff] }
  0xcb   : > { %v1310_v13 = vld [vmem:[%s2414_s6] ss:$0 sm:$0xff] }
  0xd8   : > { %v579_v15 = vpop.f32.mrf.mxu0 }
  0xd9   : > { %v599_v16 = vpop.f32.mrf.mxu1  ;;  %v580_v17 = vadd.f32 %v579_v15, %v560_v12  ;;  %v712_v12 = vld [vmem:[%s2415_s7 + $0x38] sm:$0xff]  ;;  %v714_v15 = vld [vmem:[%s2415_s7 + $0x48] sm:$0xff] }
  0xda   : > { %847 = vmatpush.msra.mxu0 %v712_v12  ;;  %887 = vmatpush.msra.mxu3 %v714_v15  ;;  %v711_v12 = vld [vmem:[%s2415_s7 + $0x30] sm:$0xff] }
  0xdb   : > { %v600_v19 = vadd.f32 %v599_v16, %v580_v17  ;;  %v757_v16 = vld [vmem:[%s2415_s7 + $0x1a0] sm:$0xff] }
  0xdc   : > { %901 = vmatpush.msrb.mxu2 %v757_v16 }
  0xdd   : > { %v620_v20 = vadd.f32 %v619_v18, %v600_v19  ;;  %v705_v18 = vld [vmem:[%s2415_s7] sm:$0xff]  ;;  %v706_v19 = vld [vmem:[%s2415_s7 + $0x8] sm:$0xff] }
  0xde   : > { %848 = vmatpush.msra.mxu0 %v705_v18  ;;  %868 = vmatpush.msra.mxu1 %v706_v19 }
  0xdf   : > { %v622_v21 = vmax.f32 %v620_v20, 0.0  ;;  %v707_v20 = vld [vmem:[%s2415_s7 + $0x10] sm:$0xff]  ;;  %902 = vmatpush.msrb.mxu2 %v750_v25 }
  0xe0   : > { %888 = vmatpush.msra.mxu3 %v707_v20  ;;  %913 = vmatpush.msrb.mxu0 %v814_v22 }
  0xe1   : > { %659 = vmatmul.f32.vlgmr.msrb.gmra.mxu3 %v622_v21  ;;  %933 = vmatpush.msrb.mxu1 %v815_v23 }
  0xe2   : > { %953 = vmatpush.msrb.mxu3 %v816_v24  ;;  %914 = vmatpush.msrb.mxu0 %v807_v26 }
  0xe3   : > { %934 = vmatpush.msrb.mxu1 %v808_v27  ;;  %903 = vmatpush.msrb.mxu2 %v743_v29 }
  0xe4   : > { %954 = vmatpush.msrb.mxu3 %v809_v28  ;;  %915 = vmatpush.msrb.mxu0 %v800_v30 }
  0xe5   : > { %935 = vmatpush.msrb.mxu1 %v801_v31  ;;  %904 = vmatpush.msrb.mxu2 %v736_v33 }
  0xe6   : > { %955 = vmatpush.msrb.mxu3 %v802_v32  ;;  %916 = vmatpush.msrb.mxu0 %v793_v34 }
  0xe7   : > { %936 = vmatpush.msrb.mxu1 %v794_v35  ;;  %905 = vmatpush.msrb.mxu2 %v729_v37 }
  0xe8   : > { %956 = vmatpush.msrb.mxu3 %v795_v36  ;;  %917 = vmatpush.msrb.mxu0 %v786_v38 }
  0xe9   : > { %937 = vmatpush.msrb.mxu1 %v787_v39  ;;  %906 = vmatpush.msrb.mxu2 %v722_v53 }
  0xea   : > { %957 = vmatpush.msrb.mxu3 %v788_v40  ;;  %918 = vmatpush.msrb.mxu0 %v779_v41 }
  0xeb   : > { %938 = vmatpush.msrb.mxu1 %v780_v42  ;;  %907 = vmatpush.msrb.mxu2 %v715_v57 }
  0xec   : > { %958 = vmatpush.msrb.mxu3 %v781_v43  ;;  %919 = vmatpush.msrb.mxu0 %v772_v44 }
  0xed   : > { %939 = vmatpush.msrb.mxu1 %v773_v45  ;;  %908 = vmatpush.msrb.mxu2 %v708_v61 }
  0xee   : > { %959 = vmatpush.msrb.mxu3 %v774_v46  ;;  %920 = vmatpush.msrb.mxu0 %v765_v47 }
  0xef   : > { %940 = vmatpush.msrb.mxu1 %v766_v48 }
  0xf0   : > { %960 = vmatpush.msrb.mxu3 %v767_v49  ;;  %921 = vmatpush.msrb.mxu0 %v758_v50 }
  0xf1   : > { %941 = vmatpush.msrb.mxu1 %v759_v51 }
  0xf2   : > { %961 = vmatpush.msrb.mxu3 %v760_v52  ;;  %922 = vmatpush.msrb.mxu0 %v751_v54 }
  0xf3   : > { %942 = vmatpush.msrb.mxu1 %v752_v55 }
  0xf4   : > { %962 = vmatpush.msrb.mxu3 %v753_v56  ;;  %923 = vmatpush.msrb.mxu0 %v744_v58 }
  0xf5   : > { %943 = vmatpush.msrb.mxu1 %v745_v59 }
  0xf6   : > { %963 = vmatpush.msrb.mxu3 %v746_v60  ;;  %924 = vmatpush.msrb.mxu0 %v737_v62 }
  0xf7   : > { %944 = vmatpush.msrb.mxu1 %v738_v63 }
  0xf8   : > { %964 = vmatpush.msrb.mxu3 %v739_v0  ;;  %925 = vmatpush.msrb.mxu0 %v730_v1 }
  0xf9   : > { %945 = vmatpush.msrb.mxu1 %v731_v2 }
  0xfa   : > { %965 = vmatpush.msrb.mxu3 %v732_v3  ;;  %926 = vmatpush.msrb.mxu0 %v723_v4 }
  0xfb   : > { %946 = vmatpush.msrb.mxu1 %v724_v5 }
  0xfc   : > { %966 = vmatpush.msrb.mxu3 %v725_v6 }
  0xfd   : > { %947 = vmatpush.msrb.mxu1 %v717_v8 }
  0xfe   : > { %967 = vmatpush.msrb.mxu3 %v718_v9 }
  0xff   : > { %948 = vmatpush.msrb.mxu1 %v710_v11 }
 0x100   : > { %968 = vmatpush.msrb.mxu3 %v711_v12 }
 0x164   : > { %v660_v14 = vpop.f32.mrf.mxu3 }
 0x165   : > { %v661_v17 = vadd.f32 %v1309_v7, %v660_v14  ;;  %v716_v7 = vld [vmem:[%s2415_s7 + $0x58] sm:$0xff] }
 0x166   : > { %927 = vmatpush.msrb.mxu0 %v716_v7 }
 0x167   : > { %v663_v21 = vmax.f32 %v661_v17, 0.0 }
 0x168   : > { %928 = vmatpush.msrb.mxu0 %v709_v10 }
 0x169   : > { %1113 = vst [vmem:[%s2141_s25] sm:$0xff] %v663_v21  ;;  %700 = vmatmul.f32.vlgmr.msra.gmra.mxu2 %v663_v21 }
 0x1ec   : > { %v701_v14 = vpop.f32.mrf.mxu2 }
 0x1ed   : > { %v702_v15 = vadd.f32 %v1310_v13, %v701_v14 }
 0x1ef   : > { %v704_v16 = vmax.f32 %v702_v15, 0.0 }
 0x1f1   : > { %849 = vmatmul.f32.vlgmr.msra.gmra.mxu0 %v704_v16  ;;  %869 = vmatmul.f32.vlgmr.msra.gmra.mxu1 %v704_v16 }
 0x1f2   : > { %889 = vmatmul.f32.vlgmr.msra.gmra.mxu3 %v704_v16  ;;  %909 = vmatmul.f32.vlgmr.msrb.gmra.mxu2 %v704_v16 }
 0x1f9   : > { %929 = vmatmul.f32.vlgmr.msrb.gmra.mxu0 %v704_v16  ;;  %949 = vmatmul.f32.vlgmr.msrb.gmra.mxu1 %v704_v16 }
 0x1fa   : > { %969 = vmatmul.f32.vlgmr.msrb.gmra.mxu3 %v704_v16 }
 0x1fb   : > { %1366 = shalt.err (!%p1363_p3)
}
 0x1fc   : > { %1265 = dma.vmem_to_hbm [thread:$0]  (%p1528_p5), %s1148_s22, 128, %s1150_s20, %s1120_s26   ;;  %v817_v17 = vld [vmem:[%s2416_s8] sm:$0x7f] }
 0x1fd   : > { %v819_v18 = vperm.slane %v817_v17, 0  ;;  %v820_v19 = vperm.slane %v817_v17, 1  ;;  %v821_v26 = vperm.slane %v817_v17, 2  ;;  %v822_v27 = vperm.slane %v817_v17, 3  ;;  %s1261_s0 = smul.u32 56, %s2084_s30  ;;  %s1115_s22 = scalar_lea.sflag [#allocation3], %s2084_s30 }
 0x1fe   : > { %v823_v28 = vperm.slane %v817_v17, 4  ;;  %v824_v29 = vperm.slane %v817_v17, 5  ;;  %v825_v44 = vperm.slane %v817_v17, 6  ;;  %s1263_s2 = smul.u32 56, %s1511_s17  ;;  %s1387_s29 = scalar_lea.hbm %s2417_s9, 112 }
 0x1ff   : > { %s2336_s1 = scalar_lea.vmem [#allocation2], %s1261_s0 }
 0x200   : > { %s1131_s11 = scalar_lea.hbm %s2417_s9, %s1263_s2  ;;  %s1133_s18 = sshll.u32 %s2336_s1, 4  ;;  %s1134_s18 = int_to_ptr.vmem [resolvable:$true] %s1133_s18 }
 0x201   : > { %s1135_s12 = sshll.u32 %s1131_s11, 4  ;;  %s1136_s12 = int_to_ptr.hbm [resolvable:$true] %s1135_s12 }
 0x202   : > { %s1381_s20 = sshra.s32 %s1136_s12, 4  ;;  %s1382_s20 = int_to_ptr.hbm [resolvable:$true] %s1381_s20 }
 0x203   : > { %s1383_s26 = scalar_lea.hbm %s1382_s20, 56  ;;  %p1388_p9 = scmp.lt.s32.totalorder %s1382_s20, %s2417_s9 }
 0x204   : > { %p1384_p4 = scmp.ne.s32.totalorder %s1382_s20, %s1383_s26  ;;  %p1389_p10 = scmp.lt.s32.totalorder %s1387_s29, %s1383_s26 }
 0x206   : > { %p1385_p7 = pnand %p1384_p4, %p1528_p5  ;;  %p1390_p11 = por %p1389_p10, %p1388_p9 }
 0x208   : > { %p1386_p8 = pneg %p1385_p7 }
 0x20a   : > { %p1391_p12 = pnand %p1390_p11, %p1386_p8 }
 0x26e   : > { %v850_v20 = vpop.f32.mrf.mxu0  ;;  %v870_v21 = vpop.f32.mrf.mxu1 }
 0x26f   : > { %v851_v22 = vadd.f32 %v850_v20, %v819_v18  ;;  %v871_v23 = vadd.f32 %v870_v21, %v820_v19 }
 0x271   : > { %v1249_v24 = vmul.f32 -1.442695, %v851_v22  ;;  %v1250_v25 = vmul.f32 -1.442695, %v871_v23 }
 0x273   : > { %1311 = vpow2.f32 %v1249_v24 }
 0x274   : > { %1313 = vpow2.f32 %v1250_v25 }
 0x275   : > { %v890_v30 = vpop.f32.mrf.mxu3  ;;  %v910_v31 = vpop.f32.mrf.mxu2 }
 0x276   : > { %v891_v32 = vadd.f32 %v890_v30, %v821_v26  ;;  %v911_v33 = vadd.f32 %v910_v31, %v822_v27  ;;  %v930_v34 = vpop.f32.mrf.mxu0  ;;  %v950_v35 = vpop.f32.mrf.mxu1 }
 0x277   : > { %v931_v36 = vadd.f32 %v930_v34, %v823_v28  ;;  %v951_v37 = vadd.f32 %v950_v35, %v824_v29 }
 0x278   : > { %v1251_v38 = vmul.f32 -1.442695, %v891_v32  ;;  %v1252_v39 = vmul.f32 -1.442695, %v911_v33 }
 0x279   : > { %v1312_v40 = vpop.eup %1311  ;;  %v1253_v43 = vmul.f32 -1.442695, %v931_v36  ;;  %v1254_v46 = vmul.f32 -1.442695, %v951_v37 }
 0x27a   : > { %v1314_v41 = vpop.eup %1313  ;;  %v994_v42 = vadd.f32 1.0, %v1312_v40  ;;  %1315 = vpow2.f32 %v1251_v38 }
 0x27b   : > { %v995_v45 = vadd.f32 1.0, %v1314_v41  ;;  %1317 = vpow2.f32 %v1252_v39 }
 0x27c   : > { %1319 = vrcp.f32 %v994_v42  ;;  %v1010_v61 = vand.u32 2147483647, %v994_v42  ;;  %v1012_v62 = vand.u32 2147483648, %v994_v42  ;;  %vm1006_vm3 = vweird.f32 %v994_v42 }
 0x27d   : > { %1321 = vrcp.f32 %v995_v45  ;;  %v970_v47 = vpop.f32.mrf.mxu3  ;;  %v1025_v0 = vand.u32 2147483647, %v995_v45  ;;  %v1027_v1 = vand.u32 2147483648, %v995_v45  ;;  %vm1021_vm4 = vweird.f32 %v995_v45 }
 0x27e   : > { %1323 = vpow2.f32 %v1253_v43  ;;  %v971_v48 = vadd.f32 %v970_v47, %v825_v44  ;;  %vm1011_vm6 = vcmp.eq.f32.partialorder %v1010_v61, 8.507059e+37  ;;  %v1013_v9 = vor.u32 1.1754944e-38, %v1012_v62 }
 0x27f   : > { %1325 = vpow2.f32 %v1254_v46  ;;  %vm1026_vm8 = vcmp.eq.f32.partialorder %v1025_v0, 8.507059e+37  ;;  %v1028_v14 = vor.u32 1.1754944e-38, %v1027_v1 }
 0x280   : > { %v1316_v49 = vpop.eup %1315  ;;  %v1255_v50 = vmul.f32 -1.442695, %v971_v48 }
 0x281   : > { %v1318_v51 = vpop.eup %1317  ;;  %v2319_v52 = vadd.f32 1.0, %v1316_v49 }
 0x282   : > { %v1320_v53 = vpop.eup %1319  ;;  %v2321_v54 = vadd.f32 1.0, %v1318_v51 }
 0x283   : > { %v1322_v55 = vpop.eup %1321  ;;  %v1002_v56 = vmul.f32 %v1320_v53, %v994_v42  ;;  %1327 = vrcp.f32 %v2319_v52  ;;  %vm1007_vm1 = vweird.f32 %v1320_v53  ;;  %v1040_v20 = vand.u32 2147483647, %v2319_v52 }
 0x284   : > { %v1324_v57 = vpop.eup %1323  ;;  %v1017_v58 = vmul.f32 %v1322_v55, %v995_v45  ;;  %1329 = vpow2.f32 %v1255_v50  ;;  %vm1022_vm2 = vweird.f32 %v1322_v55  ;;  %vm1008_vm5 = vmor %vm1006_vm3, %vm1007_vm1  ;;  %v1042_v21 = vand.u32 2147483648, %v2319_v52 }
 0x285   : > { %v1326_v59 = vpop.eup %1325  ;;  %v1003_v60 = vsub.f32 1.0, %v1002_v56  ;;  %1331 = vrcp.f32 %v2321_v54  ;;  %v2326_v3 = vadd.f32 1.0, %v1324_v57  ;;  %vm1023_vm7 = vmor %vm1021_vm4, %vm1022_vm2  ;;  %v1055_v22 = vand.u32 2147483647, %v2321_v54 }
 0x286   : > { %v1018_v63 = vsub.f32 1.0, %v1017_v58  ;;  %v2328_v4 = vadd.f32 1.0, %v1326_v59  ;;  %vm1036_vm10 = vweird.f32 %v2319_v52  ;;  %vm1051_vm11 = vweird.f32 %v2321_v54 }
 0x287   : > { %v1004_v2 = vmul.f32 %v1320_v53, %v1003_v60  ;;  %1333 = vrcp.f32 %v2326_v3  ;;  %v1057_v27 = vand.u32 2147483648, %v2321_v54  ;;  %vm1041_vm14 = vcmp.eq.f32.partialorder %v1040_v20, 8.507059e+37 }
 0x288   : > { %v1019_v5 = vmul.f32 %v1322_v55, %v1018_v63  ;;  %1335 = vrcp.f32 %v2328_v4  ;;  %v1043_v32 = vor.u32 1.1754944e-38, %v1042_v21  ;;  %vm2349_vm15 = vcmp.eq.f32.partialorder %v1055_v22, 8.507059e+37 }
 0x289   : > { %v1328_v6 = vpop.eup %1327  ;;  %v1005_v7 = vadd.f32 %v1320_v53, %v1004_v2  ;;  %v1058_v39 = vor.u32 1.1754944e-38, %v1057_v27  ;;  %v1070_v40 = vand.u32 2147483647, %v2326_v3  ;;  %v1072_v41 = vand.u32 2147483648, %v2326_v3 }
 0x28a   : > { %v1330_v8 = vpop.eup %1329  ;;  %v1020_v10 = vadd.f32 %v1322_v55, %v1019_v5  ;;  %v1032_v11 = vmul.f32 %v1328_v6, %v2319_v52  ;;  %vm1037_vm9 = vweird.f32 %v1328_v6  ;;  %vm1066_vm3 = vweird.f32 %v2326_v3 }
 0x28b   : > { %v1332_v12 = vpop.eup %1331  ;;  %v1009_v13 = vsel %vm1008_vm5, %v1320_v53, %v1005_v7  ;;  %v2343_v25 = vadd.f32 1.0, %v1330_v8  ;;  %vm1038_vm13 = vmor %vm1036_vm10, %vm1037_vm9  ;;  %v1087_v46 = vand.u32 2147483648, %v2328_v4  ;;  %v1085_v49 = vand.u32 2147483647, %v2328_v4 }
 0x28c   : > { %v1014_v15 = vsel %vm1011_vm6, %v1013_v9, %v1009_v13  ;;  %v1024_v16 = vsel %vm1023_vm7, %v1322_v55, %v1020_v10  ;;  %v1033_v17 = vsub.f32 1.0, %v1032_v11  ;;  %v1047_v18 = vmul.f32 %v1332_v12, %v2321_v54 }
 0x28d   : > { %1106 = vst [vmem:[%s2336_s1] sm:$0xff] %v1014_v15  ;;  %v1029_v19 = vsel %vm1026_vm8, %v1028_v14, %v1024_v16  ;;  %v1334_v26 = vpop.eup %1333  ;;  %vm1052_vm12 = vweird.f32 %v1332_v12  ;;  %1337 = vrcp.f32 %v2343_v25  ;;  %vm1071_vm6 = vcmp.eq.f32.partialorder %v1070_v40, 8.507059e+37 }
 0x28e   : > { %1107 = vst [vmem:[%s2336_s1 + $0x8] sm:$0xff] %v1029_v19  ;;  %v1034_v23 = vmul.f32 %v1328_v6, %v1033_v17  ;;  %v1048_v24 = vsub.f32 1.0, %v1047_v18  ;;  %v1062_v30 = vmul.f32 %v1334_v26, %v2326_v3  ;;  %v1336_v31 = vpop.eup %1335  ;;  %vm1053_vm1 = vmor %vm1051_vm11, %vm1052_vm12  ;;  %vm1067_vm2 = vweird.f32 %v1334_v26 }
 0x28f   : > { %v1077_v37 = vmul.f32 %v1336_v31, %v2328_v4  ;;  %vm1082_vm4 = vweird.f32 %v1336_v31  ;;  %vm1068_vm5 = vmor %vm1066_vm3, %vm1067_vm2  ;;  %v1073_v51 = vor.u32 1.1754944e-38, %v1072_v41  ;;  %vm1081_vm7 = vweird.f32 %v2328_v4 }
 0x290   : > { %v1035_v28 = vadd.f32 %v1328_v6, %v1034_v23  ;;  %v1049_v29 = vmul.f32 %v1332_v12, %v1048_v24  ;;  %v1063_v36 = vsub.f32 1.0, %v1062_v30  ;;  %vm1083_vm8 = vmor %vm1081_vm7, %vm1082_vm4  ;;  %v1088_v56 = vor.u32 1.1754944e-38, %v1087_v46 }
 0x291   : > { %v1078_v44 = vsub.f32 1.0, %v1077_v37  ;;  %vm1086_vm9 = vcmp.eq.f32.partialorder %v1085_v49, 8.507059e+37  ;;  %v1102_v60 = vand.u32 2147483648, %v2343_v25  ;;  %v1100_v62 = vand.u32 2147483647, %v2343_v25 }
 0x292   : > { %v1039_v34 = vsel %vm1038_vm13, %v1328_v6, %v1035_v28  ;;  %v1050_v35 = vadd.f32 %v1332_v12, %v1049_v29  ;;  %v1064_v43 = vmul.f32 %v1334_v26, %v1063_v36  ;;  %vm1096_vm11 = vweird.f32 %v2343_v25 }
 0x293   : > { %v1044_v38 = vsel %vm1041_vm14, %v1043_v32, %v1039_v34  ;;  %v1079_v48 = vmul.f32 %v1336_v31, %v1078_v44  ;;  %v1338_v50 = vpop.eup %1337  ;;  %v1103_v0 = vor.u32 1.1754944e-38, %v1102_v60  ;;  %vm1101_vm13 = vcmp.eq.f32.partialorder %v1100_v62, 8.507059e+37 }
 0x294   : > { %1108 = vst [vmem:[%s2336_s1 + $0x10] sm:$0xff] %v1044_v38  ;;  %v1054_v42 = vsel %vm1053_vm1, %v1332_v12, %v1050_v35  ;;  %v1065_v47 = vadd.f32 %v1334_v26, %v1064_v43  ;;  %v1092_v54 = vmul.f32 %v1338_v50, %v2343_v25  ;;  %vm1097_vm10 = vweird.f32 %v1338_v50 }
 0x295   : > { %v1059_v45 = vsel %vm2349_vm15, %v1058_v39, %v1054_v42  ;;  %v1080_v53 = vadd.f32 %v1336_v31, %v1079_v48  ;;  %vm1098_vm12 = vmor %vm1096_vm11, %vm1097_vm10 }
 0x296   : > { %1109 = vst [vmem:[%s2336_s1 + $0x18] sm:$0xff] %v1059_v45  ;;  %v1069_v52 = vsel %vm1068_vm5, %v1334_v26, %v1065_v47  ;;  %v1093_v58 = vsub.f32 1.0, %v1092_v54 }
 0x297   : > { %v1074_v55 = vsel %vm1071_vm6, %v1073_v51, %v1069_v52  ;;  %v1084_v57 = vsel %vm1083_vm8, %v1336_v31, %v1080_v53 }
 0x298   : > { %1110 = vst [vmem:[%s2336_s1 + $0x20] sm:$0xff] %v1074_v55  ;;  %v1089_v59 = vsel %vm1086_vm9, %v1088_v56, %v1084_v57  ;;  %v1094_v61 = vmul.f32 %v1338_v50, %v1093_v58 }
 0x299   : > { %1111 = vst [vmem:[%s2336_s1 + $0x28] sm:$0xff] %v1089_v59 }
 0x29a   : > { %v1095_v63 = vadd.f32 %v1338_v50, %v1094_v61 }
 0x29c   : > { %v1099_v1 = vsel %vm1098_vm12, %v1338_v50, %v1095_v63 }
 0x29d   : > { %v1104_v2 = vsel %vm1101_vm13, %v1103_v0, %v1099_v1 }
 0x29e   : > { %1112 = vst.msk [vmem:[%s2336_s1 + $0x30] sm:$0xff] %vm478_vm0, %v1104_v2 }
 0x29f   : > { %1394 = shalt.err (!%p1391_p12)
}
 0x2a0   : > { %1264 = dma.vmem_to_hbm [thread:$0]  (%p1528_p5), %s1134_s18, 896, %s1136_s12, %s1115_s22  }
 0x2a1 PF: > { %p1275_p13 = scmp.ge.s32.totalorder %s1433_s16, 2  ;;  %s1161_s30 = sand.u32 1, %s1421_s13  }
 0x2a2   : > { %s1162_s0 = scalar_lea.sflag [#allocation3], %s1161_s30 }
 0x2a3   : > { %p1269_p0 = pnand %p1275_p13, %p1532_p6 }
 0x2a5   : > { %p1270_p1 = pneg %p1269_p0 }
 0x2a7   : > { %1412 = dma.done.wait (%p1270_p1), %s1162_s0, 896  }
 0x2a8   : > { %1414 = vsyncadd (%p1270_p1), %s1162_s0, 4294966400  ;;  %s1172_s1 = scalar_lea.sflag [#allocation5], %s1161_s30 }
 0x2a9   : > { %1416 = dma.done.wait (%p1270_p1), %s1172_s1, 128  }
 0x2aa   : > { %1418 = vsyncadd (%p1270_p1), %s1172_s1, 4294967168  ;;  %s2432_s23 = sld [smem:[#allocation8_spill]]  ;;  %p24_p5 = scmp.ge.s32.totalorder %s1515_s19, 4  }
 0x2ab   : > { %s2433_s13 = smov %s1425_s14  ;;  %s2434_s14 = smov %s1429_s15 }
 0x2ac   : > { %s2436_s16 = smov %s1515_s19  ;;  %26 = sbr.rel (!%p24_p5) target bundleno = 10 (0xa), region = 108 }
 0x2b0   : > { %s2435_s15 = smov %s2432_s23 }
 0x2b1   :  { %1178 = vsyncpa [#allocation3], 1 }
 0x2b2   :  { %1180 = vsyncpa [#allocation3 + $0x1], 1 }
 0x2b3   :  { %1181 = vsyncpa [#allocation5], 1 }
 0x2b4   :  { %1183 = vsyncpa [#allocation5 + $0x1], 1 }

</bundles_post_ra>
